<compile_context>
chip_gen: v7x
topology: tpu7x:2x2x1
jax: 0.10.0
libtpu: 0.0.40
codegen_flags: <defaults>
</compile_context>

<pallas_src>
import functools

import jax
import jax.numpy as jnp
from jax.experimental import pallas as pl
from jax.experimental.pallas import tpu as pltpu

_EPS = 1e-5
_LANE = 128
_MAX_TILE_B = 4096                      # batch rows per grid step (VMEM-safe on v7x)
_VMEM_LIMIT = 48 * 1024 * 1024          # scoped VMEM limit (<= 64 MiB/TC on v7x)
_FUSED_H_BUDGET = 24 * 1024 * 1024      # max bytes of persistent f32 hidden scratch


def _round_up(x, m):
    return (x + m - 1) // m * m


def _hidden(x_ref, w1_ref, b1_ref):
    """h = ReLU(x @ W1 + b1): single K=(d1+d2+d3) bf16 matmul, f32 accumulation."""
    return jnp.maximum(
        jnp.dot(x_ref[...], w1_ref[...], preferred_element_type=jnp.float32)
        + b1_ref[...], 0.0)


def _softmax_out(logit, o_ref):
    m = jnp.max(logit, axis=-1, keepdims=True)
    e = jnp.exp(logit - m)
    inv = pl.reciprocal(jnp.sum(e, axis=-1, keepdims=True), approx=True)
    o_ref[...] = (e * inv).astype(o_ref.dtype)


# ---------------------------------------------------------------------------
# Fused single-call path: grid = (2 phases, batch tiles), h kept in VMEM.
# ---------------------------------------------------------------------------
def _fused_kernel(x_ref, w1_ref, b1_ref, gamma_ref, beta_ref, w2_ref, b2_ref,
                  o_ref, h_ref, sum_ref, sq_ref, *, tile_b, inv_n, n_pad):
    phase = pl.program_id(0)
    i = pl.program_id(1)
    row0 = pl.multiple_of(i * tile_b, tile_b)

    @pl.when(phase == 0)
    def _stats_phase():
        @pl.when(i == 0)
        def _():
            # Start the accumulators at minus the analytic contribution of the
            # zero-padded batch rows (each pad row adds ReLU(b1) / ReLU(b1)^2),
            # so no per-step row masking is needed in the hot loop.
            rb1 = jnp.maximum(b1_ref[...], 0.0)
            sum_ref[...] = -n_pad * rb1
            sq_ref[...] = -n_pad * rb1 * rb1

        h = _hidden(x_ref, w1_ref, b1_ref)
        h_ref[pl.ds(row0, tile_b), :] = h
        sum_ref[...] += jnp.sum(h, axis=0, keepdims=True)
        sq_ref[...] += jnp.sum(h * h, axis=0, keepdims=True)

    @pl.when(phase == 1)
    def _apply_phase():
        mean = sum_ref[...] * inv_n
        var = jnp.maximum(sq_ref[...] * inv_n - mean * mean, 0.0)   # clamp >= 0
        scale = gamma_ref[...] * jax.lax.rsqrt(var + _EPS)
        shift = beta_ref[...] - mean * scale
        hn = h_ref[pl.ds(row0, tile_b), :] * scale + shift
        logit = jnp.dot(hn.astype(jnp.bfloat16), w2_ref[...],
                        preferred_element_type=jnp.float32) + b2_ref[...]
        _softmax_out(logit, o_ref)


# ---------------------------------------------------------------------------
# Two-pass fallback for batches whose hidden activations exceed the VMEM budget.
# ---------------------------------------------------------------------------
def _stats_kernel(x_ref, w1_ref, b1_ref, psum_ref, psq_ref):
    """Per-tile partial moments, reduced to an (8, H) sublane-aligned block."""
    h = _hidden(x_ref, w1_ref, b1_ref)
    h3 = h.reshape(h.shape[0] // 8, 8, h.shape[1])
    psum_ref[...] = jnp.sum(h3, axis=0)
    psq_ref[...] = jnp.sum(h3 * h3, axis=0)


def _main_kernel(x_ref, w1_ref, b1_ref, w2_ref, b2_ref, o_ref):
    """matmul -> ReLU -> (BN folded into W2/b2) matmul -> softmax."""
    h = _hidden(x_ref, w1_ref, b1_ref)
    logit = jnp.dot(h.astype(jnp.bfloat16), w2_ref[...],
                    preferred_element_type=jnp.float32) + b2_ref[...]
    _softmax_out(logit, o_ref)


def _pad_classifier(w2_eff, b2_eff, c_pad):
    """Lane-dense (128-wide) classifier; padded logit columns get a -1e30 bias so
    exp() underflows to exactly 0 and they never affect the softmax."""
    h, c = w2_eff.shape
    w2p = jnp.zeros((h, c_pad), jnp.bfloat16).at[:, :c].set(
        w2_eff.astype(jnp.bfloat16))
    b2p = jnp.full((1, c_pad), -1e30, jnp.float32).at[:, :c].set(
        b2_eff.reshape(1, c).astype(jnp.float32))
    return w2p, b2p


@functools.partial(jax.jit, static_argnames=("force_two_pass",))
def concat_concat_mlp(x1, x2, x3, params, force_two_pass=False):
    w1, b1, gamma, beta, w2, b2 = params

    B = x1.shape[0]
    Ktot = x1.shape[1] + x2.shape[1] + x3.shape[1]
    H = w1.shape[1]
    C = w2.shape[1]
    C_pad = _round_up(C, _LANE)

    # Fused concat: one tiny XLA concat + bf16 cast, reused by every kernel pass
    # (halves the activation HBM read; Linear1 becomes a single K=Ktot dot).
    x = jnp.concatenate([x1, x2, x3], axis=1).astype(jnp.bfloat16)

    # ---- batch tiling ------------------------------------------------------
    tile_b = _round_up(B, 16) if B <= _MAX_TILE_B else _MAX_TILE_B
    B_pad = _round_up(B, tile_b)
    n_pad = B_pad - B
    if n_pad:
        x = jnp.pad(x, ((0, n_pad), (0, 0)))
    num_tiles = B_pad // tile_b

    w1b = w1.astype(jnp.bfloat16)                       # (Ktot, H)
    b1r = b1.reshape(1, H).astype(jnp.float32)
    gammar = gamma.reshape(1, H).astype(jnp.float32)
    betar = beta.reshape(1, H).astype(jnp.float32)

    use_fused = (not force_two_pass) and (B_pad * H * 4 <= _FUSED_H_BUDGET)

    if use_fused:
        # -------- single fused call: stats phase then apply phase ----------
        w2p, b2p = _pad_classifier(w2.astype(jnp.float32),
                                   b2.astype(jnp.float32), C_pad)
        out_pad = pl.pallas_call(
            functools.partial(_fused_kernel, tile_b=tile_b,
                              inv_n=1.0 / B, n_pad=float(n_pad)),
            out_shape=jax.ShapeDtypeStruct((B_pad, C_pad), jnp.bfloat16),
            grid=(2, num_tiles),
            in_specs=[
                # x pinned to tile 0 during phase 1 (unused then -> no re-read).
                pl.BlockSpec((tile_b, Ktot), lambda p, i: (i * (1 - p), 0)),
                pl.BlockSpec((Ktot, H), lambda p, i: (0, 0)),
                pl.BlockSpec((1, H), lambda p, i: (0, 0)),
                pl.BlockSpec((1, H), lambda p, i: (0, 0)),
                pl.BlockSpec((1, H), lambda p, i: (0, 0)),
                pl.BlockSpec((H, C_pad), lambda p, i: (0, 0)),
                pl.BlockSpec((1, C_pad), lambda p, i: (0, 0)),
            ],
            # Output pinned to block 0 during phase 0 so no garbage is flushed.
            out_specs=pl.BlockSpec((tile_b, C_pad), lambda p, i: (i * p, 0)),
            scratch_shapes=[
                pltpu.VMEM((B_pad, H), jnp.float32),    # persistent hidden acts
                pltpu.VMEM((1, H), jnp.float32),        # sum(h)
                pltpu.VMEM((1, H), jnp.float32),        # sum(h*h)
            ],
            compiler_params=pltpu.CompilerParams(
                dimension_semantics=("arbitrary", "arbitrary"),
                vmem_limit_bytes=_VMEM_LIMIT),
        )(x, w1b, b1r, gammar, betar, w2p, b2p)
    else:
        # -------- pass 1: per-tile partial moments (megacore-parallel) ------
        psum, psq = pl.pallas_call(
            _stats_kernel,
            out_shape=(jax.ShapeDtypeStruct((num_tiles * 8, H), jnp.float32),
                       jax.ShapeDtypeStruct((num_tiles * 8, H), jnp.float32)),
            grid=(num_tiles,),
            in_specs=[
                pl.BlockSpec((tile_b, Ktot), lambda i: (i, 0)),
                pl.BlockSpec((Ktot, H), lambda i: (0, 0)),
                pl.BlockSpec((1, H), lambda i: (0, 0)),
            ],
            out_specs=(pl.BlockSpec((8, H), lambda i: (i, 0)),
                       pl.BlockSpec((8, H), lambda i: (i, 0))),
            compiler_params=pltpu.CompilerParams(
                dimension_semantics=("parallel",),
                vmem_limit_bytes=_VMEM_LIMIT),
        )(x, w1b, b1r)

        # Finish the reduction, correct for zero-padded rows, fold BN into W2/b2.
        rb1 = jnp.maximum(b1r, 0.0)
        sums = jnp.sum(psum, axis=0, keepdims=True) - n_pad * rb1
        sqs = jnp.sum(psq, axis=0, keepdims=True) - n_pad * rb1 * rb1
        mean = sums / B
        var = jnp.maximum(sqs / B - mean * mean, 0.0)   # biased var, clamped >= 0
        scale = gammar * jax.lax.rsqrt(var + _EPS)      # (1, H)
        shift = betar - mean * scale                    # (1, H)
        w2f = w2.astype(jnp.float32)
        w2_eff = w2f * scale.reshape(H, 1)              # (H, C)
        b2_eff = b2.reshape(1, C).astype(jnp.float32) + shift @ w2f
        w2p, b2p = _pad_classifier(w2_eff, b2_eff, C_pad)

        # -------- pass 2: matmul -> relu -> (folded BN) matmul -> softmax ---
        out_pad = pl.pallas_call(
            _main_kernel,
            out_shape=jax.ShapeDtypeStruct((B_pad, C_pad), jnp.bfloat16),
            grid=(num_tiles,),
            in_specs=[
                pl.BlockSpec((tile_b, Ktot), lambda i: (i, 0)),
                pl.BlockSpec((Ktot, H), lambda i: (0, 0)),
                pl.BlockSpec((1, H), lambda i: (0, 0)),
                pl.BlockSpec((H, C_pad), lambda i: (0, 0)),
                pl.BlockSpec((1, C_pad), lambda i: (0, 0)),
            ],
            out_specs=pl.BlockSpec((tile_b, C_pad), lambda i: (i, 0)),
            compiler_params=pltpu.CompilerParams(
                dimension_semantics=("parallel",),
                vmem_limit_bytes=_VMEM_LIMIT),
        )(x, w1b, b1r, w2p, b2p)

    # Slice back to (B, C); the bf16 -> f32 upcast is folded into this small copy.
    return out_pad[:B, :C].astype(jnp.float32)


def init_params(key, input_dim, hidden, num_classes):
    """Mirror the PyTorch model_init(): kaiming_normal_ (fan_in, gain=sqrt(2)) on
    Linear weights, zero biases; BatchNorm1d gamma=1, beta=0."""
    k1, k2 = jax.random.split(key)
    std1 = (2.0 / input_dim) ** 0.5
    std2 = (2.0 / hidden) ** 0.5
    w1 = jax.random.normal(k1, (input_dim, hidden), jnp.float32) * std1   # (in, out)
    b1 = jnp.zeros((1, hidden), jnp.float32)
    gamma = jnp.ones((1, hidden), jnp.float32)
    beta = jnp.zeros((1, hidden), jnp.float32)
    w2 = jax.random.normal(k2, (hidden, num_classes), jnp.float32) * std2
    b2 = jnp.zeros((1, num_classes), jnp.float32)
    return (w1, b1, gamma, beta, w2, b2)


def _reference(x1, x2, x3, params):
    """Pure-JAX f32 reference of the PyTorch forward (training-mode BN)."""
    w1, b1, gamma, beta, w2, b2 = params
    x = jnp.concatenate([x1, x2, x3], axis=1).astype(jnp.float32)
    h = jnp.maximum(x @ w1 + b1, 0.0)
    mean = jnp.mean(h, axis=0, keepdims=True)
    var = jnp.mean((h - mean) ** 2, axis=0, keepdims=True)
    hn = (h - mean) * jax.lax.rsqrt(var + _EPS) * gamma + beta
    logit = hn @ w2 + b2
    return jax.nn.softmax(logit, axis=-1)


if __name__ == "__main__":
    # Small shapes consistent with the module; batch deliberately not a multiple
    # of 16 so the pad-row correction path is exercised.
    batch = 12
    input_dim1, input_dim2, input_dim3 = 16, 32, 16
    num_classes = 10
    hidden = 256
    input_dim = input_dim1 + input_dim2 + input_dim3

    key = jax.random.PRNGKey(0)
    kx1, kx2, kx3, kp = jax.random.split(key, 4)
    x1 = jax.random.normal(kx1, (batch, input_dim1), jnp.float32)
    x2 = jax.random.normal(kx2, (batch, input_dim2), jnp.float32)
    x3 = jax.random.normal(kx3, (batch, input_dim3), jnp.float32)
    params = init_params(kp, input_dim, hidden, num_classes)

    ref = jax.block_until_ready(_reference(x1, x2, x3, params))

    # Fused single-call path (default for this batch size).
    out = jax.block_until_ready(concat_concat_mlp(x1, x2, x3, params))
    assert out.shape == (batch, num_classes)
    assert bool(jnp.allclose(jnp.sum(out, axis=-1), 1.0, atol=1e-2))
    assert bool(jnp.allclose(out, ref, atol=2.5e-2)), float(jnp.max(jnp.abs(out - ref)))

    # Two-pass fallback (used automatically for very large batches); validate too.
    out2 = jax.block_until_ready(
        concat_concat_mlp(x1, x2, x3, params, force_two_pass=True))
    assert out2.shape == (batch, num_classes)
    assert bool(jnp.allclose(out2, ref, atol=2.5e-2)), float(jnp.max(jnp.abs(out2 - ref)))

    print("KERNEL_OK")
</pallas_src>

<mosaic_0001>
module attributes {stable_mosaic.version = 11 : i64} {
  func.func @_fused_kernel(%arg0: i32, %arg1: i32, %arg2: memref<16x64xbf16, #tpu.memory_space<vmem>>, %arg3: memref<64x256xbf16, #tpu.memory_space<vmem>>, %arg4: memref<1x256xf32, #tpu.memory_space<vmem>>, %arg5: memref<1x256xf32, #tpu.memory_space<vmem>>, %arg6: memref<1x256xf32, #tpu.memory_space<vmem>>, %arg7: memref<256x128xbf16, #tpu.memory_space<vmem>>, %arg8: memref<1x128xf32, #tpu.memory_space<vmem>>, %arg9: memref<16x128xbf16, #tpu.memory_space<vmem>>, %arg10: memref<16x256xf32, #tpu.memory_space<vmem>>, %arg11: memref<1x256xf32, #tpu.memory_space<vmem>>, %arg12: memref<1x256xf32, #tpu.memory_space<vmem>>) attributes {dimension_semantics = [#tpu.dimension_semantics<arbitrary>, #tpu.dimension_semantics<arbitrary>], iteration_bounds = array<i64: 2, 1>, scalar_prefetch = 0 : i64, scratch_operands = 3 : i64, tpu.core_type = #tpu.core_type<tc>, window_params = [{transform_indices = @transform_0, window_bounds = array<i64: 16, 64>}, {pipeline_mode = #tpu.pipeline_mode<synchronous>, transform_indices = @transform_1, window_bounds = array<i64: 64, 256>}, {pipeline_mode = #tpu.pipeline_mode<synchronous>, transform_indices = @transform_2, window_bounds = array<i64: 1, 256>}, {pipeline_mode = #tpu.pipeline_mode<synchronous>, transform_indices = @transform_3, window_bounds = array<i64: 1, 256>}, {pipeline_mode = #tpu.pipeline_mode<synchronous>, transform_indices = @transform_4, window_bounds = array<i64: 1, 256>}, {pipeline_mode = #tpu.pipeline_mode<synchronous>, transform_indices = @transform_5, window_bounds = array<i64: 256, 128>}, {pipeline_mode = #tpu.pipeline_mode<synchronous>, transform_indices = @transform_6, window_bounds = array<i64: 1, 128>}, {transform_indices = @transform_7, window_bounds = array<i64: 16, 128>}]} {
    %c16_i32 = arith.constant 16 : i32
    %0 = arith.muli %arg1, %c16_i32 : i32
    %1 = tpu.assume_multiple %0, 16 : i32
    %c0_i32 = arith.constant 0 : i32
    %2 = arith.cmpi eq, %arg0, %c0_i32 : i32
    %3 = arith.extui %2 : i1 to i32
    %c0_i32_0 = arith.constant 0 : i32
    %4 = arith.cmpi ne, %3, %c0_i32_0 : i32
    scf.if %4 {
      %c0_i32_2 = arith.constant 0 : i32
      %8 = arith.cmpi eq, %arg1, %c0_i32_2 : i32
      %9 = arith.extui %8 : i1 to i32
      %c0_i32_3 = arith.constant 0 : i32
      %10 = arith.cmpi ne, %9, %c0_i32_3 : i32
      scf.if %10 {
        %c0_21 = arith.constant 0 : index
        %c0_22 = arith.constant 0 : index
        %32 = vector.load %arg4[%c0_21, %c0_22] : memref<1x256xf32, #tpu.memory_space<vmem>>, vector<1x256xf32>
        %cst_23 = arith.constant 0.000000e+00 : f32
        %33 = vector.broadcast %cst_23 : f32 to vector<1x256xf32>
        %34 = arith.maximumf %32, %33 : vector<1x256xf32>
        %cst_24 = arith.constant -4.000000e+00 : f32
        %35 = vector.broadcast %cst_24 : f32 to vector<1x256xf32>
        %36 = arith.mulf %35, %34 : vector<1x256xf32>
        %c0_25 = arith.constant 0 : index
        %c0_26 = arith.constant 0 : index
        %37 = vector.load %arg11[%c0_25, %c0_26] : memref<1x256xf32, #tpu.memory_space<vmem>>, vector<1x256xf32>
        tpu.vector_store %arg11[%c0_25, %c0_26], %36 {strides = array<i32>} : memref<1x256xf32, #tpu.memory_space<vmem>>, vector<1x256xf32>,
        %cst_27 = arith.constant -4.000000e+00 : f32
        %38 = vector.broadcast %cst_27 : f32 to vector<1x256xf32>
        %39 = arith.mulf %38, %34 : vector<1x256xf32>
        %40 = arith.mulf %39, %34 : vector<1x256xf32>
        %c0_28 = arith.constant 0 : index
        %c0_29 = arith.constant 0 : index
        %41 = vector.load %arg12[%c0_28, %c0_29] : memref<1x256xf32, #tpu.memory_space<vmem>>, vector<1x256xf32>
        tpu.vector_store %arg12[%c0_28, %c0_29], %40 {strides = array<i32>} : memref<1x256xf32, #tpu.memory_space<vmem>>, vector<1x256xf32>,
      } else {
      }
      %c0 = arith.constant 0 : index
      %c0_4 = arith.constant 0 : index
      %11 = vector.load %arg2[%c0, %c0_4] : memref<16x64xbf16, #tpu.memory_space<vmem>>, vector<16x64xbf16>
      %c0_5 = arith.constant 0 : index
      %c0_6 = arith.constant 0 : index
      %12 = vector.load %arg3[%c0_5, %c0_6] : memref<64x256xbf16, #tpu.memory_space<vmem>>, vector<64x256xbf16>
      %cst = arith.constant dense<0.000000e+00> : vector<16x256xf32>
      %13 = tpu.matmul %11, %12, %cst {dimension_numbers = #tpu.dot_dimension_numbers<[1], [0], [0], [1], [0, 0, 1, 1], [], []>} : vector<16x64xbf16>, vector<64x256xbf16>, vector<16x256xf32> -> vector<16x256xf32>
      %c0_7 = arith.constant 0 : index
      %c0_8 = arith.constant 0 : index
      %14 = vector.load %arg4[%c0_7, %c0_8] : memref<1x256xf32, #tpu.memory_space<vmem>>, vector<1x256xf32>
      %15 = vector.broadcast %14 : vector<1x256xf32> to vector<16x256xf32>
      %16 = arith.addf %13, %15 : vector<16x256xf32>
      %cst_9 = arith.constant 0.000000e+00 : f32
      %17 = vector.broadcast %cst_9 : f32 to vector<16x256xf32>
      %18 = arith.maximumf %16, %17 : vector<16x256xf32>
      %19 = arith.index_cast %1 : i32 to index
      %c0_10 = arith.constant 0 : index
      %20 = vector.load %arg10[%19, %c0_10] : memref<16x256xf32, #tpu.memory_space<vmem>>, vector<16x256xf32>
      tpu.vector_store %arg10[%19, %c0_10], %18 {strides = array<i32>} : memref<16x256xf32, #tpu.memory_space<vmem>>, vector<16x256xf32>,
      %c0_11 = arith.constant 0 : index
      %c0_12 = arith.constant 0 : index
      %21 = vector.load %arg11[%c0_11, %c0_12] : memref<1x256xf32, #tpu.memory_space<vmem>>, vector<1x256xf32>
      %cst_13 = arith.constant dense<0.000000e+00> : vector<256xf32>
      %22 = vector.multi_reduction <add>, %18, %cst_13 [0] : vector<16x256xf32> to vector<256xf32>
      %23 = vector.shape_cast %22 : vector<256xf32> to vector<1x256xf32>
      %24 = arith.addf %21, %23 : vector<1x256xf32>
      %c0_14 = arith.constant 0 : index
      %c0_15 = arith.constant 0 : index
      %25 = vector.load %arg11[%c0_14, %c0_15] : memref<1x256xf32, #tpu.memory_space<vmem>>, vector<1x256xf32>
      tpu.vector_store %arg11[%c0_14, %c0_15], %24 {strides = array<i32>} : memref<1x256xf32, #tpu.memory_space<vmem>>, vector<1x256xf32>,
      %c0_16 = arith.constant 0 : index
      %c0_17 = arith.constant 0 : index
      %26 = vector.load %arg12[%c0_16, %c0_17] : memref<1x256xf32, #tpu.memory_space<vmem>>, vector<1x256xf32>
      %27 = arith.mulf %18, %18 : vector<16x256xf32>
      %cst_18 = arith.constant dense<0.000000e+00> : vector<256xf32>
      %28 = vector.multi_reduction <add>, %27, %cst_18 [0] : vector<16x256xf32> to vector<256xf32>
      %29 = vector.shape_cast %28 : vector<256xf32> to vector<1x256xf32>
      %30 = arith.addf %26, %29 : vector<1x256xf32>
      %c0_19 = arith.constant 0 : index
      %c0_20 = arith.constant 0 : index
      %31 = vector.load %arg12[%c0_19, %c0_20] : memref<1x256xf32, #tpu.memory_space<vmem>>, vector<1x256xf32>
      tpu.vector_store %arg12[%c0_19, %c0_20], %30 {strides = array<i32>} : memref<1x256xf32, #tpu.memory_space<vmem>>, vector<1x256xf32>,
    } else {
    }
    %c1_i32 = arith.constant 1 : i32
    %5 = arith.cmpi eq, %arg0, %c1_i32 : i32
    %6 = arith.extui %5 : i1 to i32
    %c0_i32_1 = arith.constant 0 : i32
    %7 = arith.cmpi ne, %6, %c0_i32_1 : i32
    scf.if %7 {
      %c0 = arith.constant 0 : index
      %c0_2 = arith.constant 0 : index
      %8 = vector.load %arg11[%c0, %c0_2] : memref<1x256xf32, #tpu.memory_space<vmem>>, vector<1x256xf32>
      %cst = arith.constant 0.0833333358 : f32
      %9 = vector.broadcast %cst : f32 to vector<1x256xf32>
      %10 = arith.mulf %8, %9 : vector<1x256xf32>
      %c0_3 = arith.constant 0 : index
      %c0_4 = arith.constant 0 : index
      %11 = vector.load %arg12[%c0_3, %c0_4] : memref<1x256xf32, #tpu.memory_space<vmem>>, vector<1x256xf32>
      %cst_5 = arith.constant 0.0833333358 : f32
      %12 = vector.broadcast %cst_5 : f32 to vector<1x256xf32>
      %13 = arith.mulf %11, %12 : vector<1x256xf32>
      %14 = arith.mulf %10, %10 : vector<1x256xf32>
      %15 = arith.subf %13, %14 : vector<1x256xf32>
      %cst_6 = arith.constant 0.000000e+00 : f32
      %16 = vector.broadcast %cst_6 : f32 to vector<1x256xf32>
      %17 = arith.maximumf %15, %16 : vector<1x256xf32>
      %c0_7 = arith.constant 0 : index
      %c0_8 = arith.constant 0 : index
      %18 = vector.load %arg5[%c0_7, %c0_8] : memref<1x256xf32, #tpu.memory_space<vmem>>, vector<1x256xf32>
      %cst_9 = arith.constant 9.99999974E-6 : f32
      %19 = vector.broadcast %cst_9 : f32 to vector<1x256xf32>
      %20 = arith.addf %17, %19 : vector<1x256xf32>
      %21 = math.rsqrt %20 : vector<1x256xf32>
      %22 = arith.mulf %18, %21 : vector<1x256xf32>
      %c0_10 = arith.constant 0 : index
      %c0_11 = arith.constant 0 : index
      %23 = vector.load %arg6[%c0_10, %c0_11] : memref<1x256xf32, #tpu.memory_space<vmem>>, vector<1x256xf32>
      %24 = arith.mulf %10, %22 : vector<1x256xf32>
      %25 = arith.subf %23, %24 : vector<1x256xf32>
      %26 = arith.index_cast %1 : i32 to index
      %c0_12 = arith.constant 0 : index
      %27 = vector.load %arg10[%26, %c0_12] : memref<16x256xf32, #tpu.memory_space<vmem>>, vector<16x256xf32>
      %28 = vector.broadcast %22 : vector<1x256xf32> to vector<16x256xf32>
      %29 = arith.mulf %27, %28 : vector<16x256xf32>
      %30 = vector.broadcast %25 : vector<1x256xf32> to vector<16x256xf32>
      %31 = arith.addf %29, %30 : vector<16x256xf32>
      %32 = arith.truncf %31 : vector<16x256xf32> to vector<16x256xbf16>
      %c0_13 = arith.constant 0 : index
      %c0_14 = arith.constant 0 : index
      %33 = vector.load %arg7[%c0_13, %c0_14] : memref<256x128xbf16, #tpu.memory_space<vmem>>, vector<256x128xbf16>
      %cst_15 = arith.constant dense<0.000000e+00> : vector<16x128xf32>
      %34 = tpu.matmul %32, %33, %cst_15 {dimension_numbers = #tpu.dot_dimension_numbers<[1], [0], [0], [1], [0, 0, 1, 1], [], []>} : vector<16x256xbf16>, vector<256x128xbf16>, vector<16x128xf32> -> vector<16x128xf32>
      %c0_16 = arith.constant 0 : index
      %c0_17 = arith.constant 0 : index
      %35 = vector.load %arg8[%c0_16, %c0_17] : memref<1x128xf32, #tpu.memory_space<vmem>>, vector<1x128xf32>
      %36 = vector.broadcast %35 : vector<1x128xf32> to vector<16x128xf32>
      %37 = arith.addf %34, %36 : vector<16x128xf32>
      %cst_18 = arith.constant dense<0xFF800000> : vector<16xf32>
      %38 = vector.multi_reduction <maximumf>, %37, %cst_18 [1] : vector<16x128xf32> to vector<16xf32>
      %39 = vector.shape_cast %38 : vector<16xf32> to vector<16x1xf32>
      %40 = vector.broadcast %39 : vector<16x1xf32> to vector<16x128xf32>
      %41 = arith.subf %37, %40 : vector<16x128xf32>
      %42 = math.exp %41 : vector<16x128xf32>
      %cst_19 = arith.constant dense<0.000000e+00> : vector<16xf32>
      %43 = vector.multi_reduction <add>, %42, %cst_19 [1] : vector<16x128xf32> to vector<16xf32>
      %44 = vector.shape_cast %43 : vector<16xf32> to vector<16x1xf32>
      %45 = tpu.reciprocal %44 {approx = true} : vector<16x1xf32> -> vector<16x1xf32>
      %46 = vector.broadcast %45 : vector<16x1xf32> to vector<16x128xf32>
      %47 = arith.mulf %42, %46 : vector<16x128xf32>
      %48 = arith.truncf %47 : vector<16x128xf32> to vector<16x128xbf16>
      %c0_20 = arith.constant 0 : index
      %c0_21 = arith.constant 0 : index
      %49 = vector.load %arg9[%c0_20, %c0_21] : memref<16x128xbf16, #tpu.memory_space<vmem>>, vector<16x128xbf16>
      tpu.vector_store %arg9[%c0_20, %c0_21], %48 {strides = array<i32>} : memref<16x128xbf16, #tpu.memory_space<vmem>>, vector<16x128xbf16>,
    } else {
    }
    return
  }
  func.func @transform_0(%arg0: i32, %arg1: i32) -> (i32, i32) {
    %c1_i32 = arith.constant 1 : i32
    %0 = arith.subi %c1_i32, %arg0 : i32
    %1 = arith.muli %arg1, %0 : i32
    %c0_i32 = arith.constant 0 : i32
    %c0_i32_0 = arith.constant 0 : i32
    return %1, %c0_i32 : i32, i32
  }
  func.func @transform_1(%arg0: i32, %arg1: i32) -> (i32, i32) {
    %c0_i32 = arith.constant 0 : i32
    %c0_i32_0 = arith.constant 0 : i32
    %c0_i32_1 = arith.constant 0 : i32
    return %c0_i32, %c0_i32_0 : i32, i32
  }
  func.func @transform_2(%arg0: i32, %arg1: i32) -> (i32, i32) {
    %c0_i32 = arith.constant 0 : i32
    %c0_i32_0 = arith.constant 0 : i32
    %c0_i32_1 = arith.constant 0 : i32
    return %c0_i32, %c0_i32_0 : i32, i32
  }
  func.func @transform_3(%arg0: i32, %arg1: i32) -> (i32, i32) {
    %c0_i32 = arith.constant 0 : i32
    %c0_i32_0 = arith.constant 0 : i32
    %c0_i32_1 = arith.constant 0 : i32
    return %c0_i32, %c0_i32_0 : i32, i32
  }
  func.func @transform_4(%arg0: i32, %arg1: i32) -> (i32, i32) {
    %c0_i32 = arith.constant 0 : i32
    %c0_i32_0 = arith.constant 0 : i32
    %c0_i32_1 = arith.constant 0 : i32
    return %c0_i32, %c0_i32_0 : i32, i32
  }
  func.func @transform_5(%arg0: i32, %arg1: i32) -> (i32, i32) {
    %c0_i32 = arith.constant 0 : i32
    %c0_i32_0 = arith.constant 0 : i32
    %c0_i32_1 = arith.constant 0 : i32
    return %c0_i32, %c0_i32_0 : i32, i32
  }
  func.func @transform_6(%arg0: i32, %arg1: i32) -> (i32, i32) {
    %c0_i32 = arith.constant 0 : i32
    %c0_i32_0 = arith.constant 0 : i32
    %c0_i32_1 = arith.constant 0 : i32
    return %c0_i32, %c0_i32_0 : i32, i32
  }
  func.func @transform_7(%arg0: i32, %arg1: i32) -> (i32, i32) {
    %0 = arith.muli %arg1, %arg0 : i32
    %c0_i32 = arith.constant 0 : i32
    %c0_i32_0 = arith.constant 0 : i32
    return %0, %c0_i32 : i32, i32
  }
}

</mosaic_0001>

<bundles_post_ra>
// kernel: concat_concat_mlp.1
= control target key start
LH: loop header
LB: loop body
LE: loop exit
PB: predicated region body
PF: predicated region fallthrough
CT: control target
= control target key end

     0   :  { %s1074_s24 = smov 0   ;;  %s1076_s25 = smov 0   ;;  %s1210_s0 = inlined_call_operand.vmem [shape: bf16[16,64], index: 0, kind: input, shape index: {}]   ;;  %s1211_s1 = inlined_call_operand.vmem [shape: bf16[64,256], index: 1, kind: input, shape index: {}]   ;;  %s1212_s2 = inlined_call_operand.vmem [shape: f32[1,256], index: 2, kind: input, shape index: {}]   ;;  %s1213_s3 = inlined_call_operand.vmem [shape: f32[1,256], index: 3, kind: input, shape index: {}]   ;;  %s1214_s4 = inlined_call_operand.vmem [shape: f32[1,256], index: 4, kind: input, shape index: {}]   ;;  %s1215_s5 = inlined_call_operand.vmem [shape: bf16[256,128], index: 5, kind: input, shape index: {}]   ;;  %s1216_s6 = inlined_call_operand.vmem [shape: f32[1,128], index: 6, kind: input, shape index: {}]   ;;  %s1217_s7 = inlined_call_operand.vmem [shape: bf16[16,128], index: 7, kind: output, shape index: {}]  }
   0x1   :  { %s1078_s26 = smov 0  }
   0x2 LB: > { %s29_s27 = sadd.s32 1, %s1026_s25  ;;  %p878_p0 = scmp.ge.s32.totalorder %s1030_s26, 1  ;;  %s1030_s26 = sphi %s1078_s26, %s17_s26   ;;  %s1026_s25 = sphi %s1076_s25, %s1221_s25   ;;  %s1022_s24 = sphi %s1074_s24, %s1220_s24  }
   0x3   : > { %p31_p1 = scmp.ge.s32.totalorder %s29_s27, 2  ;;  %p260_p2 = scmp.lt.s32.totalorder %s1030_s26, 3 }
   0x5   : > { %s1223_s27 = smov (%p31_p1, %s29_s27), 0  ;;  %p261_p3 = pnand %p878_p0, %p260_p2 }
   0x6   : > { %p879_p4 = scmp.ne.s32.totalorder (!%p261_p3), %s1022_s24, 0 }
   0x7   : > { %264 = sbr.rel (%p261_p3) target bundleno = 853 (0x355), region = 48 }
   0xe   : > { %318 = sbr.rel (%p879_p4) target bundleno = 275 (0x113), region = 52  ;;  %v969_v0 = vld [vmem:[%s1211_s1 + $0x4] ss:$8 sps:$4 sm:$0xff] (!%p879_p4)   ;;  %v971_v1 = vld [vmem:[%s1211_s1] ss:$8 sps:$4 sm:$0xff] (!%p879_p4)   ;;  %v1032_v2 = vmov (!%p879_p4), 0   ;;  %v326_v7 = vlaneseq (!%p879_p4) }
   0xf   : > { %436 = vmatprep.mubr.bf16.mxu0 (!%p879_p4), %v1032_v2  ;;  %404 = vmatprep.subr.bf16.mxu0 (!%p879_p4), %v969_v0  ;;  %v972_v3 = vld [vmem:[%s1211_s1 + $0x14] ss:$8 sps:$4 sm:$0xff] (!%p879_p4)   ;;  %v974_v4 = vld [vmem:[%s1211_s1 + $0x10] ss:$8 sps:$4 sm:$0xff] (!%p879_p4)   ;;  %v975_v5 = vld [vmem:[%s1211_s1 + $0x24] ss:$8 sps:$4 sm:$0xff] (!%p879_p4)  }
  0x10   : > { %405 = vmatpush1.bf16.msra.mxu0 (!%p879_p4), %v971_v1  ;;  %v323_v6 = vld [vmem:[%s1212_s2] sm:$0x3] (!%p879_p4)  ;;  %v978_v10 = vld [vmem:[%s1211_s1 + $0x34] ss:$8 sps:$4 sm:$0xff] (!%p879_p4)   ;;  %vm1119_vm0 = vcmp.lt.s32.totalorder (!%p879_p4), %v326_v7, 256  ;;  %vm400_vm1 = vcmask (!%p879_p4), 523264  }
  0x11   : > { %406 = vmatprep.subr.bf16.mxu0 (!%p879_p4), %v972_v3  ;;  %v977_v8 = vld [vmem:[%s1211_s1 + $0x20] ss:$8 sps:$4 sm:$0xff] (!%p879_p4)   ;;  %v324_v9 = vmax.f32 (!%p879_p4), %v323_v6, 0.0  ;;  %v980_v13 = vld [vmem:[%s1211_s1 + $0x30] ss:$8 sps:$4 sm:$0xff] (!%p879_p4)   ;;  %v346_v16 = vshrl.u32 (!%p879_p4), %v326_v7, 7 }
  0x12   : > { %v981_v15 = vld [vmem:[%s1210_s0] sm:$0xff] (!%p879_p4)   ;;  %v1033_v46 = vmov (!%p879_p4), 1966171168  }
  0x13   : > { %v325_v12 = vmul.f32 (!%p879_p4), -4.0, %v324_v9  ;;  %v347_v17 = vsub.s32 (!%p879_p4), 0, %v346_v16  ;;  %v343_v18 = vld [vmem:[%s1212_s2] sm:$0x3] (!%p879_p4)  ;;  %v351_v19 = vsub.s32 (!%p879_p4), 1, %v346_v16  ;;  %v479_v47 = vunpack.c.l.s4 (!%p879_p4), %v1033_v46 }
  0x14   : > { %407 = vmatpush1.bf16.msra.mxu0 (!%p879_p4), %v974_v4 }
  0x15   : > { %408 = vmatprep.subr.bf16.mxu0 %v975_v5  ;;  %330 = vst.msk [vmem:[#allocation3] sm:$0x3] %vm1119_vm0, %v325_v12  ;;  %v331_v14 = vmul.f32 %v325_v12, %v324_v9  ;;  %v348_v20 = vrot.slane %v343_v18, %v347_v17  ;;  %v352_v21 = vrot.slane %v343_v18, %v351_v19  ;;  %v480_v56 = vunpack.c.0.s8 %v479_v47 }
  0x17   : > { %332 = vst.msk [vmem:[#allocation4] sm:$0x3] %vm1119_vm0, %v331_v14  ;;  %v483_v1 = vsub.s32 %v480_v56, %v346_v16 }
  0x18   : > { %409 = vmatpush1.bf16.msra.mxu0 %v977_v8 }
  0x19   : > { %410 = vmatprep.subr.bf16.mxu0 %v978_v10 }
  0x1c   : > { %411 = vmatpush1.bf16.msra.mxu0 %v980_v13  ;;  %v460_v9 = vld [vmem:[#allocation3] sm:$0x3] }
  0x1e   : > { %v499_v13 = vld [vmem:[#allocation4] sm:$0x3] }
  0x1f   : > { %889 = vmatmul.mubr.msk.bf16.vlgmr.msra.gmra.mrb[0].mxu0 %vm400_vm1, %v981_v15 }
  0xf2   : > { %v438_v22 = vpop.f32.mrb[0].mxu0 }
  0xf3   : > { %v439_v23 = vadd.f32 %v438_v22, %v348_v20  ;;  %v440_v24 = vpop.f32.mrb[1].mxu0 }
  0xf4   : > { %v441_v25 = vadd.f32 %v440_v24, %v352_v21  ;;  %v442_v26 = vpop.f32.mrb[2].mxu0 }
  0xf5   : > { %v447_v27 = vmax.f32 %v439_v23, 0.0  ;;  %v443_v28 = vadd.f32 %v442_v26, %v348_v20  ;;  %v444_v29 = vpop.f32.mrb[3].mxu0 }
  0xf6   : > { %v448_v30 = vmax.f32 %v441_v25, 0.0  ;;  %v445_v31 = vadd.f32 %v444_v29, %v352_v21 }
  0xf7   : > { %456 = vst [vmem:[#allocation2] sm:$0xff] %v447_v27  ;;  %v449_v32 = vmax.f32 %v443_v28, 0.0  ;;  %v500_v34 = vmul.f32 %v447_v27, %v447_v27 }
  0xf8   : > { %457 = vst [vmem:[#allocation2 + $0x8] sm:$0xff] %v448_v30  ;;  %v450_v33 = vmax.f32 %v445_v31, 0.0  ;;  %v501_v37 = vmul.f32 %v448_v30, %v448_v30 }
  0xf9   : > { %458 = vst [vmem:[#allocation2 + $0x10] sm:$0xff] %v449_v32  ;;  %v461_v35 = vadd.f32 %v449_v32, %v447_v27  ;;  %v502_v36 = vmul.f32 %v449_v32, %v449_v32 }
  0xfa   : > { %459 = vst [vmem:[#allocation2 + $0x18] sm:$0xff] %v450_v33  ;;  %v468_v38 = vadd.f32 %v450_v33, %v448_v30  ;;  %v503_v39 = vmul.f32 %v450_v33, %v450_v33 }
  0xfb   : > { %v462_v40 = vrot.slane %v461_v35, 4  ;;  %v504_v41 = vadd.f32 %v502_v36, %v500_v34 }
  0xfc   : > { %v469_v42 = vrot.slane %v468_v38, 4  ;;  %v511_v43 = vadd.f32 %v503_v39, %v501_v37 }
  0xfd   : > { %v463_v44 = vadd.f32 %v462_v40, %v461_v35  ;;  %v505_v45 = vrot.slane %v504_v41, 4 }
  0xfe   : > { %v470_v48 = vadd.f32 %v469_v42, %v468_v38  ;;  %v512_v49 = vrot.slane %v511_v43, 4 }
  0xff   : > { %v464_v50 = vrot.slane %v463_v44, 2  ;;  %v506_v51 = vadd.f32 %v505_v45, %v504_v41 }
 0x100   : > { %v471_v52 = vrot.slane %v470_v48, 2  ;;  %v513_v53 = vadd.f32 %v512_v49, %v511_v43 }
 0x101   : > { %v465_v54 = vadd.f32 %v464_v50, %v463_v44  ;;  %v507_v55 = vrot.slane %v506_v51, 2 }
 0x102   : > { %v472_v57 = vadd.f32 %v471_v52, %v470_v48  ;;  %v514_v58 = vrot.slane %v513_v53, 2 }
 0x103   : > { %v466_v59 = vrot.slane %v465_v54, 1  ;;  %v508_v60 = vadd.f32 %v507_v55, %v506_v51 }
 0x104   : > { %v473_v61 = vrot.slane %v472_v57, 1  ;;  %v515_v62 = vadd.f32 %v514_v58, %v513_v53 }
 0x105   : > { %v467_v63 = vadd.f32 %v466_v59, %v465_v54  ;;  %v509_v0 = vrot.slane %v508_v60, 1 }
 0x106   : > { %v474_v2 = vadd.f32 %v473_v61, %v472_v57  ;;  %v516_v3 = vrot.slane %v515_v62, 1 }
 0x107   : > { %v510_v4 = vadd.f32 %v509_v0, %v508_v60 }
 0x108   : > { %v477_v5 = vcombine.low %v467_v63, %v474_v2  ;;  %v517_v6 = vadd.f32 %v516_v3, %v515_v62 }
 0x10a   : > { %v484_v7 = vrot.slane %v477_v5, %v483_v1  ;;  %v520_v8 = vcombine.low %v510_v4, %v517_v6 }
 0x10c   : > { %v491_v10 = vrot.slane %v484_v7, %v483_v1  ;;  %v527_v12 = vrot.slane %v520_v8, %v483_v1 }
 0x10e   : > { %v493_v14 = vadd.f32 %v491_v10, %v460_v9  ;;  %v534_v15 = vrot.slane %v527_v12, %v483_v1 }
 0x110   : > { %498 = vst.msk [vmem:[#allocation3] sm:$0x3] %vm1119_vm0, %v493_v14  ;;  %v536_v17 = vadd.f32 %v534_v15, %v499_v13 }
 0x112   : > { %537 = vst.msk [vmem:[#allocation4] sm:$0x3] %vm1119_vm0, %v536_v17 }
 0x113 PF: > { %p890_p5 = scmp.ne.s32.totalorder %s1022_s24, 1 }
 0x114   : > { %v982_v16 = vld [vmem:[%s1215_s5 + $0x40] sm:$0xff] (!%p890_p5)   ;;  %v984_v19 = vld [vmem:[%s1215_s5 + $0x48] sm:$0xff] (!%p890_p5)   ;;  %v986_v20 = vld [vmem:[%s1215_s5 + $0x50] sm:$0xff] (!%p890_p5)   ;;  %v566_v40 = vlaneseq (!%p890_p5) }
 0x115   : > { %541 = sbr.rel (%p890_p5) target bundleno = 853 (0x355), region = 60  ;;  %v983_v18 = vld [vmem:[%s1215_s5] sm:$0xff] (!%p890_p5)   ;;  %921 = vmatprep.subr.bf16.mxu0 (!%p890_p5), %v982_v16  ;;  %v985_v11 = vld [vmem:[%s1215_s5 + $0x8] sm:$0xff] (!%p890_p5)   ;;  %v987_v21 = vld [vmem:[%s1215_s5 + $0x10] sm:$0xff] (!%p890_p5)  }
 0x116   : > { %922 = vmatpush3.bf16.msra.mxu0 (!%p890_p5), %v983_v18  ;;  %v988_v22 = vld [vmem:[%s1215_s5 + $0x58] sm:$0xff] (!%p890_p5)   ;;  %v990_v24 = vld [vmem:[%s1215_s5 + $0x60] sm:$0xff] (!%p890_p5)   ;;  %v992_v26 = vld [vmem:[%s1215_s5 + $0x68] sm:$0xff] (!%p890_p5)   ;;  %v567_v41 = vshrl.u32 (!%p890_p5), %v566_v40, 7 }
 0x117   : > { %923 = vmatprep.subr.bf16.mxu0 (!%p890_p5), %v984_v19  ;;  %v989_v23 = vld [vmem:[%s1215_s5 + $0x18] sm:$0xff] (!%p890_p5)   ;;  %v991_v25 = vld [vmem:[%s1215_s5 + $0x20] sm:$0xff] (!%p890_p5)   ;;  %v993_v31 = vld [vmem:[%s1215_s5 + $0x28] sm:$0xff] (!%p890_p5)  }
 0x118   : > { %v994_v33 = vld [vmem:[%s1215_s5 + $0x70] sm:$0xff] (!%p890_p5)   ;;  %v996_v37 = vld [vmem:[%s1215_s5 + $0x78] sm:$0xff] (!%p890_p5)   ;;  %v549_v42 = vld [vmem:[%s1213_s3] sm:$0x3] (!%p890_p5)  ;;  %v572_v43 = vsub.s32 (!%p890_p5), 1, %v567_v41  ;;  %v568_v44 = vsub.s32 (!%p890_p5), 0, %v567_v41 }
 0x119   : > { %v544_v28 = vld [vmem:[#allocation4] sm:$0x3] (!%p890_p5)  ;;  %v995_v35 = vld [vmem:[%s1215_s5 + $0x30] sm:$0xff] (!%p890_p5)   ;;  %v997_v39 = vld [vmem:[%s1215_s5 + $0x38] sm:$0xff] (!%p890_p5)  }
 0x11a   : > { %924 = vmatpush3.bf16.msra.mxu0 (!%p890_p5), %v985_v11  ;;  %v542_v27 = vld [vmem:[#allocation3] sm:$0x3] (!%p890_p5)  ;;  %v545_v30 = vmul.f32 (!%p890_p5), 0.083333336, %v544_v28  ;;  %v562_v48 = vld [vmem:[#allocation2 + $0x8] sm:$0xff] (!%p890_p5)  ;;  %v564_v49 = vld [vmem:[#allocation2 + $0x18] sm:$0xff] (!%p890_p5) }
 0x11b   : > { %925 = vmatprep.subr.bf16.mxu0 (!%p890_p5), %v986_v20  ;;  %v543_v29 = vmul.f32 (!%p890_p5), 0.083333336, %v542_v27  ;;  %v553_v47 = vld [vmem:[%s1214_s4] sm:$0x3] (!%p890_p5)  ;;  %v563_v53 = vld [vmem:[#allocation2 + $0x10] sm:$0xff] (!%p890_p5) }
 0x11c   : > { %v561_v50 = vld [vmem:[#allocation2] sm:$0xff] }
 0x11d   : > { %v546_v32 = vmul.f32 %v543_v29, %v543_v29  ;;  %v891_v6 = vld [vmem:[%s1216_s6] ss:$0 sm:$0xff] }
 0x11e   : > { %926 = vmatpush3.bf16.msra.mxu0 %v987_v21 }
 0x11f   : > { %927 = vmatprep.subr.bf16.mxu0 %v988_v22  ;;  %v547_v34 = vsub.f32 %v545_v30, %v546_v32 }
 0x121   : > { %v548_v36 = vmax.f32 %v547_v34, 0.0 }
 0x122   : > { %928 = vmatpush3.bf16.msra.mxu0 %v989_v23 }
 0x123   : > { %929 = vmatprep.subr.bf16.mxu0 %v990_v24  ;;  %v550_v38 = vadd.f32 1e-05, %v548_v36 }
 0x125   : > { %998 = vrsqrt.f32 %v550_v38 }
 0x126   : > { %930 = vmatpush3.bf16.msra.mxu0 %v991_v25 }
 0x127   : > { %931 = vmatprep.subr.bf16.mxu0 %v992_v26 }
 0x12a   : > { %932 = vmatpush3.bf16.msra.mxu0 %v993_v31 }
 0x12b   : > { %933 = vmatprep.subr.bf16.mxu0 %v994_v33 }
 0x12e   : > { %934 = vmatpush3.bf16.msra.mxu0 %v995_v35 }
 0x12f   : > { %935 = vmatprep.subr.bf16.mxu0 %v996_v37  ;;  %v999_v45 = vpop.eup %998 }
 0x130   : > { %v552_v46 = vmul.f32 %v999_v45, %v549_v42 }
 0x132   : > { %936 = vmatpush3.bf16.msra.mxu0 %v997_v39  ;;  %v554_v51 = vmul.f32 %v552_v46, %v543_v29  ;;  %v573_v52 = vrot.slane %v552_v46, %v572_v43  ;;  %v569_v54 = vrot.slane %v552_v46, %v568_v44 }
 0x134   : > { %v555_v55 = vsub.f32 %v553_v47, %v554_v51  ;;  %v577_v56 = vmul.f32 %v573_v52, %v562_v48  ;;  %v579_v57 = vmul.f32 %v573_v52, %v564_v49  ;;  %v576_v58 = vmul.f32 %v569_v54, %v561_v50 }
 0x135   : > { %v578_v59 = vmul.f32 %v569_v54, %v563_v53 }
 0x136   : > { %v588_v60 = vrot.slane %v555_v55, %v572_v43  ;;  %v584_v61 = vrot.slane %v555_v55, %v568_v44 }
 0x138   : > { %v592_v62 = vadd.f32 %v588_v60, %v577_v56  ;;  %v594_v63 = vadd.f32 %v588_v60, %v579_v57  ;;  %v591_v0 = vadd.f32 %v584_v61, %v576_v58  ;;  %v593_v1 = vadd.f32 %v584_v61, %v578_v59 }
 0x13a   : > { %v596_v2 = vpack.c.bf16 %v594_v63, %v592_v62  ;;  %v595_v3 = vpack.c.bf16 %v593_v1, %v591_v0 }
 0x13c   : > { %764 = vmatprep.mubr.bf16.mxu0 %v596_v2 }
 0x13d   : > { %765 = vmatmul.mubr.bf16.vlgmr.msra.gmra.mrb[0].mxu0 %v595_v3 }
 0x210   : > { %v937_v4 = vpop.f32.mrb[0].mxu0 }
 0x211   : > { %v938_v5 = vpop.f32.mrb[1].mxu0 }
 0x212   : > { %v939_v7 = vadd.f32 %v938_v5, %v937_v4  ;;  %v940_v8 = vpop.f32.mrb[2].mxu0 }
 0x213   : > { %v941_v9 = vpop.f32.mrb[3].mxu0 }
 0x214   : > { %v942_v10 = vadd.f32 %v941_v9, %v940_v8  ;;  %v767_v12 = vadd.f32 %v939_v7, %v891_v6 }
 0x216   : > { %773 = vmax.xlane.f32.xlu0 %v767_v12  ;;  %v770_v13 = vadd.f32 %v942_v10, %v891_v6 }
 0x21a   : > { %775 = vmax.xlane.f32.xlu0 %v770_v13 }
 0x2a3   : > { %v774_v14 = vpop.xlane.xlu0 %773 }
 0x2a4   : > { %v777_v15 = vsub.f32 %v767_v12, %v774_v14 }
 0x2a6   : > { %v779_v17 = vmul.f32 1.442695, %v777_v15 }
 0x2a7   : > { %v776_v16 = vpop.xlane.xlu0 %775 }
 0x2a8   : > { %1000 = vpow2.f32 %v779_v17  ;;  %v778_v18 = vsub.f32 %v770_v13, %v776_v16 }
 0x2aa   : > { %v781_v19 = vmul.f32 1.442695, %v778_v18 }
 0x2ac   : > { %1002 = vpow2.f32 %v781_v19 }
 0x2b2   : > { %v1001_v11 = vpop.eup %1000 }
 0x2b3   : > { %783 = vadd.xlane.f32.xlu1 %v1001_v11 }
 0x2b6   : > { %v1003_v20 = vpop.eup %1002 }
 0x2b7   : > { %785 = vadd.xlane.f32.xlu1 %v1003_v20 }
 0x340   : > { %v784_v21 = vpop.xlane.xlu1 %783 }
 0x341   : > { %1004 = vrcp.f32 %v784_v21 }
 0x344   : > { %v786_v22 = vpop.xlane.xlu1 %785 }
 0x345   : > { %1006 = vrcp.f32 %v786_v22 }
 0x34b   : > { %v1005_v23 = vpop.eup %1004 }
 0x34c   : > { %v789_v25 = vmul.f32 %v1005_v23, %v1001_v11 }
 0x34f   : > { %v1007_v24 = vpop.eup %1006 }
 0x350   : > { %v790_v26 = vmul.f32 %v1007_v24, %v1003_v20 }
 0x352   : > { %v919_v27 = vpack.c.bf16 %v790_v26, %v789_v25 }
 0x354   : > { %920 = vst [vmem:[%s1217_s7] sm:$0xff] %v919_v27  }
 0x355 PF: > { %s17_s26 = sadd.s32 1, %s1030_s26   ;;  %s1220_s24 = smov %s1026_s25 }
 0x356   : > { %p14_p6 = scmp.ge.s32.totalorder %s17_s26, 4   ;;  %s1221_s25 = smov %s1223_s27 }
 0x358   :  { %16 = sbr.rel (!%p14_p6) target bundleno = 2 (0x2), region = 92 }

</bundles_post_ra>
